<compile_context>
chip_gen: v5e
topology: v5e:2x2
jax: 0.10.0
libtpu: 0.0.40
codegen_flags: <defaults>
</compile_context>

<pallas_src>
import functools

import jax
import jax.numpy as jnp
from jax.experimental import pallas as pl
from jax.experimental.pallas import tpu as pltpu

MARGIN = 2.0
EPS = 1e-6          # matches torch F.pairwise_distance default eps
_LANES = 128
# 2 inputs x 2 pipeline buffers of (TB, D) must fit in this budget
# (keeps headroom under v7x's 64 MiB VMEM; v5e/v6e have 128 MiB).
_VMEM_INPUT_BUDGET = 32 * 1024 * 1024


def _contrastive_tile_kernel(x1_ref, x2_ref, lab_ref, out_ref, *,
                             tb, total_b, margin):
    i = pl.program_id(0)

    x1 = x1_ref[...].astype(jnp.float32)            # (TB, D)
    x2 = x2_ref[...].astype(jnp.float32)            # (TB, D)
    lab = lab_ref[...].astype(jnp.float32)          # (TB, 1)

    diff = x1 - x2 + EPS
    sqdist = jnp.sum(diff * diff, axis=-1, keepdims=True)   # (TB, 1)
    dist = jnp.sqrt(sqdist)                                  # pairwise_distance
    hinge = jnp.maximum(margin - dist, 0.0)
    # use sqdist directly for the positive term (no sqrt->square round trip)
    per_pair = (1.0 - lab) * sqdist + lab * (hinge * hinge)  # (TB, 1)

    # Mask rows past the true batch size (possibly-partial last tile).
    row = jax.lax.broadcasted_iota(jnp.int32, per_pair.shape, 0)
    valid = (i * tb + row) < total_b
    per_pair = jnp.where(valid, per_pair, 0.0)

    tile_sum = jnp.sum(per_pair)                    # scalar partial sum
    out_ref[...] = jnp.broadcast_to(tile_sum, out_ref.shape).astype(jnp.float32)


def contrastive_loss(output1, output2, label, margin=MARGIN):
    B, D = output1.shape
    label2d = jnp.reshape(label, (B, 1))

    itemsize = jnp.dtype(output1.dtype).itemsize
    # Pick the largest batch tile whose double-buffered input footprint fits.
    tb = _VMEM_INPUT_BUDGET // max(1, 2 * 2 * D * itemsize)
    tb = max(8, min(int(tb), 4096))
    tb = (tb // 8) * 8                  # sublane-aligned tile
    if B <= tb:
        tb = B                          # single full-extent tile
    num_tiles = pl.cdiv(B, tb)

    kernel = functools.partial(_contrastive_tile_kernel,
                               tb=tb, total_b=B, margin=float(margin))

    cost = pl.CostEstimate(
        flops=3 * B * D + 10 * B,
        transcendentals=B,
        bytes_accessed=(2 * B * D * itemsize
                        + B * jnp.dtype(label2d.dtype).itemsize
                        + num_tiles * _LANES * 4),
    )

    partials = pl.pallas_call(
        kernel,
        out_shape=jax.ShapeDtypeStruct((num_tiles, 1, _LANES), jnp.float32),
        grid_spec=pltpu.PrefetchScalarGridSpec(
            num_scalar_prefetch=0,
            grid=(num_tiles,),
            in_specs=[
                pl.BlockSpec((tb, D), lambda i: (i, 0)),
                pl.BlockSpec((tb, D), lambda i: (i, 0)),
                pl.BlockSpec((tb, 1), lambda i: (i, 0)),
            ],
            out_specs=pl.BlockSpec((1, 1, _LANES), lambda i: (i, 0, 0)),
        ),
        compiler_params=pltpu.CompilerParams(
            dimension_semantics=("parallel",),
            vmem_limit_bytes=48 * 1024 * 1024,
        ),
        cost_estimate=cost,
    )(output1, output2, label2d)

    # Each tile broadcast its partial sum across the 128 lanes; take lane 0,
    # reduce over tiles, divide by the TRUE batch size.
    return jnp.sum(partials[:, 0, 0]) / jnp.float32(B)


def _reference(output1, output2, label):
    # Pure-JAX reference mirroring the PyTorch module.
    diff = output1.astype(jnp.float32) - output2.astype(jnp.float32) + EPS
    dist = jnp.sqrt(jnp.sum(diff * diff, axis=-1, keepdims=True))
    lab = label.reshape(-1, 1).astype(jnp.float32)
    return jnp.mean((1.0 - lab) * dist ** 2
                    + lab * jnp.maximum(MARGIN - dist, 0.0) ** 2)


if __name__ == "__main__":
    key = jax.random.PRNGKey(0)
    k1, k2, k3 = jax.random.split(key, 3)

    B, D = 8, 32
    output1 = jax.random.normal(k1, (B, D), dtype=jnp.float32)
    output2 = jax.random.normal(k2, (B, D), dtype=jnp.float32)
    # labels in {0, 1}, shape (B, 1) like a siamese-pair label
    label = jax.random.bernoulli(k3, 0.5, (B, 1)).astype(jnp.float32)

    loss = contrastive_loss(output1, output2, label)
    loss = jax.block_until_ready(loss)

    ref = _reference(output1, output2, label)
    assert jnp.allclose(loss, ref, rtol=1e-5, atol=1e-5), (loss, ref)

    print("KERNEL_OK")
</pallas_src>

<mosaic_0001>
module attributes {stable_mosaic.version = 11 : i64} {
  func.func @_contrastive_tile_kernel(%arg0: i32, %arg1: memref<8x32xf32, #tpu.memory_space<vmem>>, %arg2: memref<8x32xf32, #tpu.memory_space<vmem>>, %arg3: memref<8x1xf32, #tpu.memory_space<vmem>>, %arg4: memref<1x1x128xf32, #tpu.memory_space<vmem>>) attributes {dimension_semantics = [#tpu.dimension_semantics<parallel>], iteration_bounds = array<i64: 1>, scalar_prefetch = 0 : i64, scratch_operands = 0 : i64, tpu.core_type = #tpu.core_type<tc>, window_params = [{transform_indices = @transform_0, window_bounds = array<i64: 8, 32>}, {transform_indices = @transform_1, window_bounds = array<i64: 8, 32>}, {transform_indices = @transform_2, window_bounds = array<i64: 8, 1>}, {transform_indices = @transform_3, window_bounds = array<i64: 1, 1, 128>}]} {
    %c0 = arith.constant 0 : index
    %c0_0 = arith.constant 0 : index
    %0 = vector.load %arg1[%c0, %c0_0] : memref<8x32xf32, #tpu.memory_space<vmem>>, vector<8x32xf32>
    %c0_1 = arith.constant 0 : index
    %c0_2 = arith.constant 0 : index
    %1 = vector.load %arg2[%c0_1, %c0_2] : memref<8x32xf32, #tpu.memory_space<vmem>>, vector<8x32xf32>
    %c0_3 = arith.constant 0 : index
    %c0_4 = arith.constant 0 : index
    %2 = vector.load %arg3[%c0_3, %c0_4] : memref<8x1xf32, #tpu.memory_space<vmem>>, vector<8x1xf32>
    %3 = arith.subf %0, %1 : vector<8x32xf32>
    %cst = arith.constant 9.99999997E-7 : f32
    %4 = vector.broadcast %cst : f32 to vector<8x32xf32>
    %5 = arith.addf %3, %4 : vector<8x32xf32>
    %6 = arith.mulf %5, %5 : vector<8x32xf32>
    %cst_5 = arith.constant dense<0.000000e+00> : vector<8xf32>
    %7 = vector.multi_reduction <add>, %6, %cst_5 [1] : vector<8x32xf32> to vector<8xf32>
    %8 = vector.shape_cast %7 : vector<8xf32> to vector<8x1xf32>
    %9 = math.sqrt %8 : vector<8x1xf32>
    %cst_6 = arith.constant 2.000000e+00 : f32
    %10 = vector.broadcast %cst_6 : f32 to vector<8x1xf32>
    %11 = arith.subf %10, %9 : vector<8x1xf32>
    %cst_7 = arith.constant 0.000000e+00 : f32
    %12 = vector.broadcast %cst_7 : f32 to vector<8x1xf32>
    %13 = arith.maximumf %11, %12 : vector<8x1xf32>
    %cst_8 = arith.constant 1.000000e+00 : f32
    %14 = vector.broadcast %cst_8 : f32 to vector<8x1xf32>
    %15 = arith.subf %14, %2 : vector<8x1xf32>
    %16 = arith.mulf %15, %8 : vector<8x1xf32>
    %17 = arith.mulf %13, %13 : vector<8x1xf32>
    %18 = arith.mulf %2, %17 : vector<8x1xf32>
    %19 = arith.addf %16, %18 : vector<8x1xf32>
    %20 = tpu.iota {dimensions = array<i32: 0>} : vector<8x1xi32>
    %c8_i32 = arith.constant 8 : i32
    %21 = arith.muli %arg0, %c8_i32 : i32
    %22 = vector.broadcast %21 : i32 to vector<8x1xi32>
    %23 = arith.addi %22, %20 : vector<8x1xi32>
    %c8_i32_9 = arith.constant 8 : i32
    %24 = vector.broadcast %c8_i32_9 : i32 to vector<8x1xi32>
    %25 = arith.cmpi slt, %23, %24 : vector<8x1xi32>
    %cst_10 = arith.constant 0.000000e+00 : f32
    %26 = vector.broadcast %cst_10 : f32 to vector<8x1xf32>
    %27 = arith.select %25, %19, %26 : vector<8x1xi1>, vector<8x1xf32>
    %28 = vector.shape_cast %27 : vector<8x1xf32> to vector<1x8x1xf32>
    %cst_11 = arith.constant dense<0.000000e+00> : vector<1xf32>
    %29 = vector.multi_reduction <add>, %28, %cst_11 [1, 2] : vector<1x8x1xf32> to vector<1xf32>
    %30 = vector.shape_cast %29 : vector<1xf32> to vector<1x1x1xf32>
    %31 = vector.extract %30[0, 0, 0] : f32 from vector<1x1x1xf32>
    %32 = vector.broadcast %31 : f32 to vector<1x1x128xf32>
    %c0_12 = arith.constant 0 : index
    %c0_13 = arith.constant 0 : index
    %c0_14 = arith.constant 0 : index
    %33 = vector.load %arg4[%c0_12, %c0_13, %c0_14] : memref<1x1x128xf32, #tpu.memory_space<vmem>>, vector<1x1x128xf32>
    tpu.vector_store %arg4[%c0_12, %c0_13, %c0_14], %32 {strides = array<i32>} : memref<1x1x128xf32, #tpu.memory_space<vmem>>, vector<1x1x128xf32>,
    return
  }
  func.func @transform_0(%arg0: i32) -> (i32, i32) {
    %c0_i32 = arith.constant 0 : i32
    %c0_i32_0 = arith.constant 0 : i32
    return %arg0, %c0_i32 : i32, i32
  }
  func.func @transform_1(%arg0: i32) -> (i32, i32) {
    %c0_i32 = arith.constant 0 : i32
    %c0_i32_0 = arith.constant 0 : i32
    return %arg0, %c0_i32 : i32, i32
  }
  func.func @transform_2(%arg0: i32) -> (i32, i32) {
    %c0_i32 = arith.constant 0 : i32
    %c0_i32_0 = arith.constant 0 : i32
    return %arg0, %c0_i32 : i32, i32
  }
  func.func @transform_3(%arg0: i32) -> (i32, i32, i32) {
    %c0_i32 = arith.constant 0 : i32
    %c0_i32_0 = arith.constant 0 : i32
    %c0_i32_1 = arith.constant 0 : i32
    return %arg0, %c0_i32, %c0_i32_0 : i32, i32, i32
  }
}

</mosaic_0001>

<bundles_post_ra>
// kernel: tpu_custom_call.1
= control target key start
LH: loop header
LB: loop body
LE: loop exit
PB: predicated region body
PF: predicated region fallthrough
CT: control target
= control target key end

     0   :  { %8 = vsyncpa [#allocation3], 0  ;;  %s187_s0 = inlined_call_operand.vmem [shape: f32[8,32], index: 0, kind: input, shape index: {}]   ;;  %s188_s1 = inlined_call_operand.hbm [shape: f32[8,32], index: 1, kind: input, shape index: {}]   ;;  %s189_s2 = inlined_call_operand.vmem [shape: f32[8,1], index: 2, kind: input, shape index: {}]   ;;  %s190_s3 = inlined_call_operand.hbm [shape: f32[1,1,128], index: 3, kind: output, shape index: {}]  }
   0x1   :  { %9 = vsyncpa [#allocation4], 0  ;;  %s17_s14 = sshll.u32 %s188_s1, 4  ;;  %s153_s15 = smov [#allocation2]   ;;  %s18_s14 = int_to_ptr.hbm [resolvable:$true] %s17_s14 }
   0x2   :  { %s19_s16 = sshll.u32 %s153_s15, 4  ;;  %s20_s16 = int_to_ptr.vmem [resolvable:$true] %s19_s16 }
   0x3   :  { %22 = dma.hbm_to_vmem [thread:$0]  %s18_s14, 128, %s20_s16, [#allocation3]  }
   0x4   :  { %149 = dma.done.wait [#allocation3], 128  }
   0x5   :  { %150 = vsyncadd [#allocation3], 4294967168  ;;  %v29_v0 = vld [vmem:[%s187_s0] sm:$0xff]  ;;  %vm35_vm0 = vcmask 261120   ;;  %vm65_vm3 = vcmask 7168   ;;  %s85_s22 = sshll.u32 %s190_s3, 4  ;;  %s86_s22 = int_to_ptr.hbm [resolvable:$true] %s85_s22 }
   0x6   :  { %v30_v1 = vld [vmem:[#allocation2] sm:$0xff] }
   0x7   :  { %v32_v2 = vsub.f32 %v29_v0, %v30_v1  ;;  %v31_v16 = vld [vmem:[%s189_s2] sm:$0xff]  ;;  %s154_s2 = smov [#allocation5]  }
   0x8   :  { %v53_v20 = vsub.f32 1.0, %v31_v16  ;;  %s83_s19 = sshll.u32 %s154_s2, 4  ;;  %s84_s19 = int_to_ptr.vmem [resolvable:$true] %s83_s19 }
   0x9   :  { %v33_v3 = vadd.f32 1e-06, %v32_v2 }
   0xb   :  { %v34_v4 = vmul.f32 %v33_v3, %v33_v3 }
   0xd   :  { %v36_v5 = vsel %vm35_vm0, %v34_v4, 0.0 }
   0xe   :  { %37 = vadd.xlane.f32.xlu0 %v36_v5 }
  0x81   :  { %v38_v6 = vpop.xlane.xlu0 %37 }
  0x82   :  { %99 = vrsqrt.f32 %v38_v6  ;;  %vm46_vm1 = vcmp.eq.f32.partialorder %v38_v6, inf  ;;  %v49_v14 = vand.u32 2147483648, %v38_v6  ;;  %vm48_vm2 = vcmp.eq.f32.partialorder %v38_v6, 0.0 }
  0x83   :  { %v54_v22 = vmul.f32 %v53_v20, %v38_v6 }
  0x88   :  { %v100_v7 = vpop.eup %99 }
  0x89   :  { %v40_v8 = vmul.f32 %v100_v7, %v38_v6 }
  0x8b   :  { %v41_v9 = vmul.f32 %v100_v7, %v40_v8 }
  0x8d   :  { %v42_v10 = vmul.f32 0.5, %v41_v9 }
  0x8f   :  { %v43_v11 = vsub.f32 1.5, %v42_v10 }
  0x91   :  { %v44_v12 = vmul.f32 %v100_v7, %v43_v11 }
  0x93   :  { %v45_v13 = vmul.f32 %v44_v12, %v38_v6 }
  0x95   :  { %v47_v15 = vsel %vm46_vm1, %v38_v6, %v45_v13 }
  0x96   :  { %v50_v17 = vsel %vm48_vm2, %v49_v14, %v47_v15 }
  0x97   :  { %v51_v18 = vsub.f32 2.0, %v50_v17 }
  0x99   :  { %v52_v19 = vmax.f32 %v51_v18, 0.0 }
  0x9b   :  { %v55_v21 = vmul.f32 %v52_v19, %v52_v19 }
  0x9d   :  { %v56_v23 = vmul.f32 %v55_v21, %v31_v16 }
  0x9f   :  { %v57_v24 = vadd.f32 %v56_v23, %v54_v22 }
  0xa1   :  { %v66_v25 = vsel %vm65_vm3, %v57_v24, 0.0 }
  0xa2   :  { %67 = vadd.xlane.f32.xlu0 %v66_v25 }
 0x115   :  { %v68_v26 = vpop.xlane.xlu0 %67 }
 0x116   :  { %v69_v27 = vrot.slane %v68_v26, 4 }
 0x118   :  { %v70_v28 = vadd.f32 %v69_v27, %v68_v26 }
 0x11a   :  { %v71_v29 = vrot.slane %v70_v28, 2 }
 0x11c   :  { %v72_v30 = vadd.f32 %v71_v29, %v70_v28 }
 0x11e   :  { %v73_v31 = vrot.slane %v72_v30, 1 }
 0x120   :  { %v74_v32 = vadd.f32 %v73_v31, %v72_v30 }
 0x122   :  { %95 = vpush %v74_v32 }
 0x153   :  { %s96_s23 = spop %95 }
 0x154   :  { %v76_v33 = vstv %s96_s23 }
 0x155   :  { %77 = vst [vmem:[#allocation5] sm:$0x1] %v76_v33 }
 0x156   :  { %88 = dma.vmem_to_hbm [thread:$0]  %s84_s19, 16, %s86_s22, [#allocation4]  }
 0x157   :  { %151 = dma.done.wait [#allocation4], 16  }
 0x158   :  { %152 = vsyncadd [#allocation4], 4294967280 }
 0x159   :  { %93 = vsyncpa [#allocation3], 1 }
 0x15a   :  { %94 = vsyncpa [#allocation4], 1 }

</bundles_post_ra>
